<compile_context>
chip_gen: v6e
topology: v6e:2x2x1
jax: 0.10.0
libtpu: 0.0.40
codegen_flags: <defaults>
</compile_context>

<pallas_src>
import functools

import jax
import jax.numpy as jnp
from jax import lax
from jax.experimental import pallas as pl
from jax.experimental.pallas import tpu as pltpu


BN_EPS = 1e-5  # nn.BatchNorm1d default eps


def _round_up(x, m):
    return ((x + m - 1) // m) * m


def actor_head_kernel(b_true, x_ref, w2_ref, b2_ref, gamma_ref, beta_ref,
                      w3_ref, b3_ref, out_ref,
                      sum_sc, sumsq_sc, scale_sc, shift_sc):
    """grid = (phase, batch_tile).

    phase 0: accumulate per-feature sum / sumsq of relu(x @ w2 + b2) over the batch.
    phase 1: recompute the fc2 tile, apply the folded BN affine, fc3 + tanh.
    """
    phase = pl.program_id(0)
    bt = pl.program_id(1)
    nb = pl.num_programs(1)
    tile_b = x_ref.shape[0]

    # fc2 + ReLU (bf16 MXU inputs, f32 accumulation). Recomputed in both phases
    # so the (B, H) intermediate never hits HBM.
    h = jnp.dot(x_ref[...], w2_ref[...], preferred_element_type=jnp.float32)
    h = jnp.maximum(h + b2_ref[...], 0.0)                      # (tile_b, H_pad) f32

    @pl.when(phase == 0)
    def _stats():
        @pl.when(bt == 0)
        def _init():
            sum_sc[...] = jnp.zeros_like(sum_sc)
            sumsq_sc[...] = jnp.zeros_like(sumsq_sc)

        # Mask rows beyond the true batch size (zero-padded input rows still
        # produce relu(b2) != 0, which would corrupt the batch statistics).
        row = bt * tile_b + lax.broadcasted_iota(jnp.int32, (tile_b, 1), 0)
        hm = jnp.where(row < b_true, h, 0.0)
        sum_sc[...] += jnp.sum(hm, axis=0, keepdims=True)
        sumsq_sc[...] += jnp.sum(hm * hm, axis=0, keepdims=True)

        # Keep the output writeback deterministic during the stats phase
        # (phase 1 overwrites every block with the real result).
        out_ref[...] = jnp.zeros_like(out_ref)

        @pl.when(bt == nb - 1)
        def _finalize():
            inv_b = 1.0 / b_true
            mean = sum_sc[...] * inv_b
            var = jnp.maximum(sumsq_sc[...] * inv_b - mean * mean, 0.0)  # biased var
            scale = gamma_ref[...] * lax.rsqrt(var + BN_EPS)
            scale_sc[...] = scale
            shift_sc[...] = beta_ref[...] - mean * scale

    @pl.when(phase == 1)
    def _apply():
        # Folded BN: h_norm = h * scale + shift  (2 VPU ops per element).
        h_bn = h * scale_sc[...] + shift_sc[...]
        y = jnp.dot(h_bn.astype(w3_ref.dtype), w3_ref[...],
                    preferred_element_type=jnp.float32) + b3_ref[...]
        out_ref[...] = jnp.tanh(y)


def actor_head_forward(state, params, *, max_tile_b=256):
    """Wrapper matching ActorHead.forward semantics (training-mode BN)."""
    if state.ndim < 2:
        state = state[None, :]
    state = state.astype(jnp.float32)

    w2_t, b2, gamma, beta, w3_t, b3 = params
    B, S = state.shape
    H = w2_t.shape[1]
    A = w3_t.shape[1]

    # Lane-dense padding (zeros -> padded hidden/action lanes contribute exactly 0).
    H_pad = _round_up(H, 128)
    A_pad = _round_up(A, 128)

    # Batch tiling: cap the tile so 2x(x tile) + 2x(out tile) + weights stay small
    # even with v7x's 64 MiB VMEM / 32 MiB default scoped limit.
    tile_b = min(max_tile_b, _round_up(B, 8))
    B_pad = _round_up(B, tile_b)
    nb = B_pad // tile_b

    # Pad + cast matmul operands to bf16 (half the weight DMA, 2x MXU throughput);
    # bias / BN params stay f32 for the elementwise path.
    x = jnp.pad(state, ((0, B_pad - B), (0, 0))).astype(jnp.bfloat16)
    w2p = jnp.pad(w2_t, ((0, 0), (0, H_pad - H))).astype(jnp.bfloat16)
    b2p = jnp.pad(b2, ((0, 0), (0, H_pad - H)))
    gammap = jnp.pad(gamma, ((0, 0), (0, H_pad - H)))
    betap = jnp.pad(beta, ((0, 0), (0, H_pad - H)))
    w3p = jnp.pad(w3_t, ((0, H_pad - H), (0, A_pad - A))).astype(jnp.bfloat16)
    b3p = jnp.pad(b3, ((0, 0), (0, A_pad - A)))

    kernel = functools.partial(actor_head_kernel, B)

    out = pl.pallas_call(
        kernel,
        out_shape=jax.ShapeDtypeStruct((B_pad, A_pad), jnp.float32),
        grid_spec=pltpu.PrefetchScalarGridSpec(
            num_scalar_prefetch=0,
            grid=(2, nb),  # (phase, batch_tile)
            in_specs=[
                pl.BlockSpec((tile_b, S), lambda p, b: (b, 0)),       # x
                pl.BlockSpec((S, H_pad), lambda p, b: (0, 0)),        # w2 (resident)
                pl.BlockSpec((1, H_pad), lambda p, b: (0, 0)),        # b2
                pl.BlockSpec((1, H_pad), lambda p, b: (0, 0)),        # gamma
                pl.BlockSpec((1, H_pad), lambda p, b: (0, 0)),        # beta
                pl.BlockSpec((H_pad, A_pad), lambda p, b: (0, 0)),    # w3 (resident)
                pl.BlockSpec((1, A_pad), lambda p, b: (0, 0)),        # b3
            ],
            out_specs=pl.BlockSpec((tile_b, A_pad), lambda p, b: (b, 0)),
            scratch_shapes=[pltpu.VMEM((1, H_pad), jnp.float32)] * 4,  # sum/sumsq/scale/shift
        ),
        compiler_params=pltpu.CompilerParams(
            # Phase axis must be ordered; batch axis shares the stats scratch,
            # so both stay "arbitrary" (no cross-TC split of the coupled reduction).
            dimension_semantics=("arbitrary", "arbitrary"),
            vmem_limit_bytes=32 * 1024 * 1024,
        ),
    )(x, w2p, b2p, gammap, betap, w3p, b3p)

    return out[:B, :A]


def init_actor_head_params(key, state_size_encoded, action_size, fc2_units=300):
    """Deterministic parameter init mirroring ActorHead.__init__ / reset_parameters.

    fc2.weight ~ U(-1/sqrt(fan_in), 1/sqrt(fan_in))   (hidden_init)
    fc2.bias   ~ U(-1/sqrt(fan_in), 1/sqrt(fan_in))   (nn.Linear default)
    fc3.weight ~ U(-3e-3, 3e-3)
    fc3.bias   ~ U(-1/sqrt(fc2_units), 1/sqrt(fc2_units))
    BatchNorm1d: gamma = 1, beta = 0
    """
    k1, k2, k3, k4 = jax.random.split(key, 4)
    lim2 = 1.0 / jnp.sqrt(jnp.float32(state_size_encoded))
    lim3b = 1.0 / jnp.sqrt(jnp.float32(fc2_units))

    # Stored transposed: (in, out) so the kernel computes x @ W + b.
    w2_t = jax.random.uniform(k1, (state_size_encoded, fc2_units),
                              jnp.float32, -lim2, lim2)
    b2 = jax.random.uniform(k2, (1, fc2_units), jnp.float32, -lim2, lim2)
    gamma = jnp.ones((1, fc2_units), jnp.float32)
    beta = jnp.zeros((1, fc2_units), jnp.float32)
    w3_t = jax.random.uniform(k3, (fc2_units, action_size),
                              jnp.float32, -0.003, 0.003)
    b3 = jax.random.uniform(k4, (1, action_size), jnp.float32, -lim3b, lim3b)
    return (w2_t, b2, gamma, beta, w3_t, b3)


def _reference_forward(state, params):
    """Pure-JAX f32 reference of the same forward pass (for correctness check)."""
    if state.ndim < 2:
        state = state[None, :]
    w2_t, b2, gamma, beta, w3_t, b3 = params
    h = jnp.maximum(state @ w2_t + b2, 0.0)
    mean = jnp.mean(h, axis=0, keepdims=True)
    var = jnp.mean((h - mean) ** 2, axis=0, keepdims=True)
    h = (h - mean) / jnp.sqrt(var + BN_EPS) * gamma + beta
    return jnp.tanh(h @ w3_t + b3)


if __name__ == "__main__":
    # Small shapes consistent with the module's forward.
    state_size_encoded = 32
    fc2_units = 300          # module default; padded to 384 inside the wrapper
    action_size = 8          # padded to 128 inside the wrapper

    key = jax.random.PRNGKey(0)
    k_params, k_state1, k_state2 = jax.random.split(key, 3)

    params = init_actor_head_params(k_params, state_size_encoded, action_size,
                                    fc2_units=fc2_units)

    # Case 1: batch fits in one tile.
    batch = 8
    state = jax.random.normal(k_state1, (batch, state_size_encoded), jnp.float32)
    out = jax.block_until_ready(actor_head_forward(state, params))
    ref = jax.block_until_ready(_reference_forward(state, params))
    assert out.shape == (batch, action_size)
    # bf16 MXU inputs vs pure-f32 reference -> loosened tolerance.
    assert jnp.allclose(out, ref, atol=2e-2, rtol=2e-2), "case 1 mismatch vs JAX reference"

    # Case 2: ragged batch spanning multiple tiles (exercises masked stats path).
    batch2 = 13
    state2 = jax.random.normal(k_state2, (batch2, state_size_encoded), jnp.float32)
    out2 = jax.block_until_ready(actor_head_forward(state2, params, max_tile_b=8))
    ref2 = jax.block_until_ready(_reference_forward(state2, params))
    assert out2.shape == (batch2, action_size)
    assert jnp.allclose(out2, ref2, atol=2e-2, rtol=2e-2), "case 2 mismatch vs JAX reference"

    print("KERNEL_OK")
</pallas_src>

<mosaic_0001>
module attributes {stable_mosaic.version = 11 : i64} {
  func.func @actor_head_kernel(%arg0: i32, %arg1: i32, %arg2: memref<8x32xbf16, #tpu.memory_space<vmem>>, %arg3: memref<32x384xbf16, #tpu.memory_space<vmem>>, %arg4: memref<1x384xf32, #tpu.memory_space<vmem>>, %arg5: memref<1x384xf32, #tpu.memory_space<vmem>>, %arg6: memref<1x384xf32, #tpu.memory_space<vmem>>, %arg7: memref<384x128xbf16, #tpu.memory_space<vmem>>, %arg8: memref<1x128xf32, #tpu.memory_space<vmem>>, %arg9: memref<8x128xf32, #tpu.memory_space<vmem>>, %arg10: memref<1x384xf32, #tpu.memory_space<vmem>>, %arg11: memref<1x384xf32, #tpu.memory_space<vmem>>, %arg12: memref<1x384xf32, #tpu.memory_space<vmem>>, %arg13: memref<1x384xf32, #tpu.memory_space<vmem>>) attributes {dimension_semantics = [#tpu.dimension_semantics<arbitrary>, #tpu.dimension_semantics<arbitrary>], iteration_bounds = array<i64: 2, 1>, scalar_prefetch = 0 : i64, scratch_operands = 4 : i64, tpu.core_type = #tpu.core_type<tc>, window_params = [{transform_indices = @transform_0, window_bounds = array<i64: 8, 32>}, {pipeline_mode = #tpu.pipeline_mode<synchronous>, transform_indices = @transform_1, window_bounds = array<i64: 32, 384>}, {pipeline_mode = #tpu.pipeline_mode<synchronous>, transform_indices = @transform_2, window_bounds = array<i64: 1, 384>}, {pipeline_mode = #tpu.pipeline_mode<synchronous>, transform_indices = @transform_3, window_bounds = array<i64: 1, 384>}, {pipeline_mode = #tpu.pipeline_mode<synchronous>, transform_indices = @transform_4, window_bounds = array<i64: 1, 384>}, {pipeline_mode = #tpu.pipeline_mode<synchronous>, transform_indices = @transform_5, window_bounds = array<i64: 384, 128>}, {pipeline_mode = #tpu.pipeline_mode<synchronous>, transform_indices = @transform_6, window_bounds = array<i64: 1, 128>}, {transform_indices = @transform_7, window_bounds = array<i64: 8, 128>}]} {
    %c0 = arith.constant 0 : index
    %c0_0 = arith.constant 0 : index
    %0 = vector.load %arg2[%c0, %c0_0] : memref<8x32xbf16, #tpu.memory_space<vmem>>, vector<8x32xbf16>
    %c0_1 = arith.constant 0 : index
    %c0_2 = arith.constant 0 : index
    %1 = vector.load %arg3[%c0_1, %c0_2] : memref<32x384xbf16, #tpu.memory_space<vmem>>, vector<32x384xbf16>
    %cst = arith.constant dense<0.000000e+00> : vector<8x384xf32>
    %2 = tpu.matmul %0, %1, %cst {dimension_numbers = #tpu.dot_dimension_numbers<[1], [0], [0], [1], [0, 0, 1, 1], [], []>} : vector<8x32xbf16>, vector<32x384xbf16>, vector<8x384xf32> -> vector<8x384xf32>
    %c0_3 = arith.constant 0 : index
    %c0_4 = arith.constant 0 : index
    %3 = vector.load %arg4[%c0_3, %c0_4] : memref<1x384xf32, #tpu.memory_space<vmem>>, vector<1x384xf32>
    %4 = vector.broadcast %3 : vector<1x384xf32> to vector<8x384xf32>
    %5 = arith.addf %2, %4 : vector<8x384xf32>
    %cst_5 = arith.constant 0.000000e+00 : f32
    %6 = vector.broadcast %cst_5 : f32 to vector<8x384xf32>
    %7 = arith.maximumf %5, %6 : vector<8x384xf32>
    %c0_i32 = arith.constant 0 : i32
    %8 = arith.cmpi eq, %arg0, %c0_i32 : i32
    %9 = arith.extui %8 : i1 to i32
    %c0_i32_6 = arith.constant 0 : i32
    %10 = arith.cmpi ne, %9, %c0_i32_6 : i32
    scf.if %10 {
      %c0_i32_8 = arith.constant 0 : i32
      %14 = arith.cmpi eq, %arg1, %c0_i32_8 : i32
      %15 = arith.extui %14 : i1 to i32
      %c0_i32_9 = arith.constant 0 : i32
      %16 = arith.cmpi ne, %15, %c0_i32_9 : i32
      scf.if %16 {
        %cst_27 = arith.constant 0.000000e+00 : f32
        %43 = vector.broadcast %cst_27 : f32 to vector<1x384xf32>
        %c0_28 = arith.constant 0 : index
        %c0_29 = arith.constant 0 : index
        %44 = vector.load %arg10[%c0_28, %c0_29] : memref<1x384xf32, #tpu.memory_space<vmem>>, vector<1x384xf32>
        tpu.vector_store %arg10[%c0_28, %c0_29], %43 {strides = array<i32>} : memref<1x384xf32, #tpu.memory_space<vmem>>, vector<1x384xf32>,
        %cst_30 = arith.constant 0.000000e+00 : f32
        %45 = vector.broadcast %cst_30 : f32 to vector<1x384xf32>
        %c0_31 = arith.constant 0 : index
        %c0_32 = arith.constant 0 : index
        %46 = vector.load %arg11[%c0_31, %c0_32] : memref<1x384xf32, #tpu.memory_space<vmem>>, vector<1x384xf32>
        tpu.vector_store %arg11[%c0_31, %c0_32], %45 {strides = array<i32>} : memref<1x384xf32, #tpu.memory_space<vmem>>, vector<1x384xf32>,
      } else {
      }
      %c8_i32 = arith.constant 8 : i32
      %17 = arith.muli %arg1, %c8_i32 : i32
      %18 = tpu.iota {dimensions = array<i32: 0>} : vector<8x1xi32>
      %19 = vector.broadcast %17 : i32 to vector<8x1xi32>
      %20 = arith.addi %19, %18 : vector<8x1xi32>
      %c8_i32_10 = arith.constant 8 : i32
      %21 = vector.broadcast %c8_i32_10 : i32 to vector<8x1xi32>
      %22 = arith.cmpi slt, %20, %21 : vector<8x1xi32>
      %cst_11 = arith.constant 0.000000e+00 : f32
      %23 = vector.shape_cast %22 : vector<8x1xi1> to vector<8x1xi1>
      %24 = vector.broadcast %23 : vector<8x1xi1> to vector<8x384xi1>
      %25 = vector.broadcast %cst_11 : f32 to vector<8x384xf32>
      %26 = arith.select %24, %7, %25 : vector<8x384xi1>, vector<8x384xf32>
      %c0_12 = arith.constant 0 : index
      %c0_13 = arith.constant 0 : index
      %27 = vector.load %arg10[%c0_12, %c0_13] : memref<1x384xf32, #tpu.memory_space<vmem>>, vector<1x384xf32>
      %cst_14 = arith.constant dense<0.000000e+00> : vector<384xf32>
      %28 = vector.multi_reduction <add>, %26, %cst_14 [0] : vector<8x384xf32> to vector<384xf32>
      %29 = vector.shape_cast %28 : vector<384xf32> to vector<1x384xf32>
      %30 = arith.addf %27, %29 : vector<1x384xf32>
      %c0_15 = arith.constant 0 : index
      %c0_16 = arith.constant 0 : index
      %31 = vector.load %arg10[%c0_15, %c0_16] : memref<1x384xf32, #tpu.memory_space<vmem>>, vector<1x384xf32>
      tpu.vector_store %arg10[%c0_15, %c0_16], %30 {strides = array<i32>} : memref<1x384xf32, #tpu.memory_space<vmem>>, vector<1x384xf32>,
      %c0_17 = arith.constant 0 : index
      %c0_18 = arith.constant 0 : index
      %32 = vector.load %arg11[%c0_17, %c0_18] : memref<1x384xf32, #tpu.memory_space<vmem>>, vector<1x384xf32>
      %33 = arith.mulf %26, %26 : vector<8x384xf32>
      %cst_19 = arith.constant dense<0.000000e+00> : vector<384xf32>
      %34 = vector.multi_reduction <add>, %33, %cst_19 [0] : vector<8x384xf32> to vector<384xf32>
      %35 = vector.shape_cast %34 : vector<384xf32> to vector<1x384xf32>
      %36 = arith.addf %32, %35 : vector<1x384xf32>
      %c0_20 = arith.constant 0 : index
      %c0_21 = arith.constant 0 : index
      %37 = vector.load %arg11[%c0_20, %c0_21] : memref<1x384xf32, #tpu.memory_space<vmem>>, vector<1x384xf32>
      tpu.vector_store %arg11[%c0_20, %c0_21], %36 {strides = array<i32>} : memref<1x384xf32, #tpu.memory_space<vmem>>, vector<1x384xf32>,
      %cst_22 = arith.constant 0.000000e+00 : f32
      %38 = vector.broadcast %cst_22 : f32 to vector<8x128xf32>
      %c0_23 = arith.constant 0 : index
      %c0_24 = arith.constant 0 : index
      %39 = vector.load %arg9[%c0_23, %c0_24] : memref<8x128xf32, #tpu.memory_space<vmem>>, vector<8x128xf32>
      tpu.vector_store %arg9[%c0_23, %c0_24], %38 {strides = array<i32>} : memref<8x128xf32, #tpu.memory_space<vmem>>, vector<8x128xf32>,
      %c0_i32_25 = arith.constant 0 : i32
      %40 = arith.cmpi eq, %arg1, %c0_i32_25 : i32
      %41 = arith.extui %40 : i1 to i32
      %c0_i32_26 = arith.constant 0 : i32
      %42 = arith.cmpi ne, %41, %c0_i32_26 : i32
      scf.if %42 {
        %c0_27 = arith.constant 0 : index
        %c0_28 = arith.constant 0 : index
        %43 = vector.load %arg10[%c0_27, %c0_28] : memref<1x384xf32, #tpu.memory_space<vmem>>, vector<1x384xf32>
        %cst_29 = arith.constant 1.250000e-01 : f32
        %44 = vector.broadcast %cst_29 : f32 to vector<1x384xf32>
        %45 = arith.mulf %43, %44 : vector<1x384xf32>
        %c0_30 = arith.constant 0 : index
        %c0_31 = arith.constant 0 : index
        %46 = vector.load %arg11[%c0_30, %c0_31] : memref<1x384xf32, #tpu.memory_space<vmem>>, vector<1x384xf32>
        %cst_32 = arith.constant 1.250000e-01 : f32
        %47 = vector.broadcast %cst_32 : f32 to vector<1x384xf32>
        %48 = arith.mulf %46, %47 : vector<1x384xf32>
        %49 = arith.mulf %45, %45 : vector<1x384xf32>
        %50 = arith.subf %48, %49 : vector<1x384xf32>
        %cst_33 = arith.constant 0.000000e+00 : f32
        %51 = vector.broadcast %cst_33 : f32 to vector<1x384xf32>
        %52 = arith.maximumf %50, %51 : vector<1x384xf32>
        %c0_34 = arith.constant 0 : index
        %c0_35 = arith.constant 0 : index
        %53 = vector.load %arg5[%c0_34, %c0_35] : memref<1x384xf32, #tpu.memory_space<vmem>>, vector<1x384xf32>
        %cst_36 = arith.constant 9.99999974E-6 : f32
        %54 = vector.broadcast %cst_36 : f32 to vector<1x384xf32>
        %55 = arith.addf %52, %54 : vector<1x384xf32>
        %56 = math.rsqrt %55 : vector<1x384xf32>
        %57 = arith.mulf %53, %56 : vector<1x384xf32>
        %c0_37 = arith.constant 0 : index
        %c0_38 = arith.constant 0 : index
        %58 = vector.load %arg12[%c0_37, %c0_38] : memref<1x384xf32, #tpu.memory_space<vmem>>, vector<1x384xf32>
        tpu.vector_store %arg12[%c0_37, %c0_38], %57 {strides = array<i32>} : memref<1x384xf32, #tpu.memory_space<vmem>>, vector<1x384xf32>,
        %c0_39 = arith.constant 0 : index
        %c0_40 = arith.constant 0 : index
        %59 = vector.load %arg6[%c0_39, %c0_40] : memref<1x384xf32, #tpu.memory_space<vmem>>, vector<1x384xf32>
        %60 = arith.mulf %45, %57 : vector<1x384xf32>
        %61 = arith.subf %59, %60 : vector<1x384xf32>
        %c0_41 = arith.constant 0 : index
        %c0_42 = arith.constant 0 : index
        %62 = vector.load %arg13[%c0_41, %c0_42] : memref<1x384xf32, #tpu.memory_space<vmem>>, vector<1x384xf32>
        tpu.vector_store %arg13[%c0_41, %c0_42], %61 {strides = array<i32>} : memref<1x384xf32, #tpu.memory_space<vmem>>, vector<1x384xf32>,
      } else {
      }
    } else {
    }
    %c1_i32 = arith.constant 1 : i32
    %11 = arith.cmpi eq, %arg0, %c1_i32 : i32
    %12 = arith.extui %11 : i1 to i32
    %c0_i32_7 = arith.constant 0 : i32
    %13 = arith.cmpi ne, %12, %c0_i32_7 : i32
    scf.if %13 {
      %c0_8 = arith.constant 0 : index
      %c0_9 = arith.constant 0 : index
      %14 = vector.load %arg12[%c0_8, %c0_9] : memref<1x384xf32, #tpu.memory_space<vmem>>, vector<1x384xf32>
      %15 = vector.broadcast %14 : vector<1x384xf32> to vector<8x384xf32>
      %16 = arith.mulf %7, %15 : vector<8x384xf32>
      %c0_10 = arith.constant 0 : index
      %c0_11 = arith.constant 0 : index
      %17 = vector.load %arg13[%c0_10, %c0_11] : memref<1x384xf32, #tpu.memory_space<vmem>>, vector<1x384xf32>
      %18 = vector.broadcast %17 : vector<1x384xf32> to vector<8x384xf32>
      %19 = arith.addf %16, %18 : vector<8x384xf32>
      %20 = arith.truncf %19 : vector<8x384xf32> to vector<8x384xbf16>
      %c0_12 = arith.constant 0 : index
      %c0_13 = arith.constant 0 : index
      %21 = vector.load %arg7[%c0_12, %c0_13] : memref<384x128xbf16, #tpu.memory_space<vmem>>, vector<384x128xbf16>
      %cst_14 = arith.constant dense<0.000000e+00> : vector<8x128xf32>
      %22 = tpu.matmul %20, %21, %cst_14 {dimension_numbers = #tpu.dot_dimension_numbers<[1], [0], [0], [1], [0, 0, 1, 1], [], []>} : vector<8x384xbf16>, vector<384x128xbf16>, vector<8x128xf32> -> vector<8x128xf32>
      %c0_15 = arith.constant 0 : index
      %c0_16 = arith.constant 0 : index
      %23 = vector.load %arg8[%c0_15, %c0_16] : memref<1x128xf32, #tpu.memory_space<vmem>>, vector<1x128xf32>
      %24 = vector.broadcast %23 : vector<1x128xf32> to vector<8x128xf32>
      %25 = arith.addf %22, %24 : vector<8x128xf32>
      %26 = math.tanh %25 : vector<8x128xf32>
      %c0_17 = arith.constant 0 : index
      %c0_18 = arith.constant 0 : index
      %27 = vector.load %arg9[%c0_17, %c0_18] : memref<8x128xf32, #tpu.memory_space<vmem>>, vector<8x128xf32>
      tpu.vector_store %arg9[%c0_17, %c0_18], %26 {strides = array<i32>} : memref<8x128xf32, #tpu.memory_space<vmem>>, vector<8x128xf32>,
    } else {
    }
    return
  }
  func.func @transform_0(%arg0: i32, %arg1: i32) -> (i32, i32) {
    %c0_i32 = arith.constant 0 : i32
    %c0_i32_0 = arith.constant 0 : i32
    return %arg1, %c0_i32 : i32, i32
  }
  func.func @transform_1(%arg0: i32, %arg1: i32) -> (i32, i32) {
    %c0_i32 = arith.constant 0 : i32
    %c0_i32_0 = arith.constant 0 : i32
    %c0_i32_1 = arith.constant 0 : i32
    return %c0_i32, %c0_i32_0 : i32, i32
  }
  func.func @transform_2(%arg0: i32, %arg1: i32) -> (i32, i32) {
    %c0_i32 = arith.constant 0 : i32
    %c0_i32_0 = arith.constant 0 : i32
    %c0_i32_1 = arith.constant 0 : i32
    return %c0_i32, %c0_i32_0 : i32, i32
  }
  func.func @transform_3(%arg0: i32, %arg1: i32) -> (i32, i32) {
    %c0_i32 = arith.constant 0 : i32
    %c0_i32_0 = arith.constant 0 : i32
    %c0_i32_1 = arith.constant 0 : i32
    return %c0_i32, %c0_i32_0 : i32, i32
  }
  func.func @transform_4(%arg0: i32, %arg1: i32) -> (i32, i32) {
    %c0_i32 = arith.constant 0 : i32
    %c0_i32_0 = arith.constant 0 : i32
    %c0_i32_1 = arith.constant 0 : i32
    return %c0_i32, %c0_i32_0 : i32, i32
  }
  func.func @transform_5(%arg0: i32, %arg1: i32) -> (i32, i32) {
    %c0_i32 = arith.constant 0 : i32
    %c0_i32_0 = arith.constant 0 : i32
    %c0_i32_1 = arith.constant 0 : i32
    return %c0_i32, %c0_i32_0 : i32, i32
  }
  func.func @transform_6(%arg0: i32, %arg1: i32) -> (i32, i32) {
    %c0_i32 = arith.constant 0 : i32
    %c0_i32_0 = arith.constant 0 : i32
    %c0_i32_1 = arith.constant 0 : i32
    return %c0_i32, %c0_i32_0 : i32, i32
  }
  func.func @transform_7(%arg0: i32, %arg1: i32) -> (i32, i32) {
    %c0_i32 = arith.constant 0 : i32
    %c0_i32_0 = arith.constant 0 : i32
    return %arg1, %c0_i32 : i32, i32
  }
}

</mosaic_0001>

<bundles_post_ra>
// kernel: tpu_custom_call.1
= control target key start
LH: loop header
LB: loop body
LE: loop exit
PB: predicated region body
PF: predicated region fallthrough
CT: control target
= control target key end

     0   :  { %12 = vsyncpa [#allocation7], 0  ;;  %s1683_s0 = inlined_call_operand.hbm [shape: bf16[8,32], index: 0, kind: input, shape index: {}]   ;;  %s1684_s1 = inlined_call_operand.hbm [shape: bf16[32,384], index: 1, kind: input, shape index: {}]   ;;  %s1685_s2 = inlined_call_operand.vmem [shape: f32[1,384], index: 2, kind: input, shape index: {}]   ;;  %s1686_s3 = inlined_call_operand.hbm [shape: f32[1,384], index: 3, kind: input, shape index: {}]   ;;  %s1687_s4 = inlined_call_operand.vmem [shape: f32[1,384], index: 4, kind: input, shape index: {}]   ;;  %s1688_s5 = inlined_call_operand.hbm [shape: bf16[384,128], index: 5, kind: input, shape index: {}]   ;;  %s1689_s6 = inlined_call_operand.vmem [shape: f32[1,128], index: 6, kind: input, shape index: {}]   ;;  %s1690_s7 = inlined_call_operand.hbm [shape: f32[8,128], index: 7, kind: output, shape index: {}]  }
   0x1   :  { %13 = vsyncpa [#allocation10], 0 }
   0x2   :  { %14 = vsyncpa [#allocation13], 0 }
   0x3   :  { %15 = vsyncpa [#allocation8], 0  ;;  %s1492_s24 = smov 0   ;;  %s1494_s25 = smov 0  }
   0x4   :  { %s1496_s26 = smov 0  }
   0x5 LB: > { %s1436_s27 = smov [#allocation9]   ;;  %s1037_s29 = sadd.s32 4294967295, %s1434_s26   ;;  %s1434_s26 = sphi %s1496_s26, %s21_s26   ;;  %s1430_s25 = sphi %s1494_s25, %s1702_s25   ;;  %s1426_s24 = sphi %s1492_s24, %s1701_s24  }
   0x6   : > { %s241_s28 = sshll.u32 %s1436_s27, 4  ;;  %p1038_p0 = scmp.ge.s32.totalorder %s1434_s26, 1  ;;  %s242_s28 = int_to_ptr.vmem [resolvable:$true] %s241_s28 }
   0x7   : > { %p216_p1 = scmp.lt.s32.totalorder %s1434_s26, 3  ;;  %p1512_p2 = scmp.eq.s32.totalorder %s1037_s29, 0 }
   0x8   : > { %s33_s10 = sadd.s32 1, %s1430_s25  ;;  %s1437_s12 = smov [#allocation6]  }
   0x9   : > { %s1693_s30 = scalar_select %p1512_p2, 1, 0 }
   0xa   : > { %p1516_p3 = pnand %p1038_p0, %p216_p1  ;;  %p1529_p6 = scmp.ge.s32.totalorder %s33_s10, 2 }
   0xb   : > { %s231_s13 = sshll.u32 %s1437_s12, 4  ;;  %s1279_s14 = scalar_lea.vmem %s242_s28, 768  ;;  %s232_s13 = int_to_ptr.vmem [resolvable:$true] %s231_s13 }
   0xc   : > { %p1169_p4 = pneg %p1516_p3  ;;  %p1280_p8 = scmp.ne.s32.totalorder %s242_s28, %s1279_s14 }
   0xd   : > { %p1287_p11 = scmp.lt.s32.totalorder %s242_s28, %s242_s28  ;;  %p1288_p12 = scmp.lt.s32.totalorder %s1279_s14, %s1279_s14 }
   0xe   : > { %p1524_p5 = pnand %p1512_p2, %p1169_p4 }
   0xf   : > { %p1289_p13 = por %p1288_p12, %p1287_p11 }
  0x10   : > { %p1270_p7 = pneg %p1524_p5 }
  0x12   : > { %p1282_p9 = pnand %p1280_p8, %p1270_p7 }
  0x14   : > { %p1283_p10 = pneg %p1282_p9 }
  0x16   : > { %p1290_p0 = pnand %p1289_p13, %p1283_p10 }
  0x18   : > { %1293 = shalt.err (!%p1290_p0)
}
  0x19   : > { %s1438_s15 = smov 192   ;;  %s1439_s16 = smov 12  }
  0x1a   : > { %1175 = dma.hbm_to_vmem [thread:$0]  (!%p1524_p5), %s1684_s1, 768, %s242_s28, [#allocation10], %s1438_s15, %s1438_s15, %s1439_s16  }
  0x1b   : > { %s1704_s10 = smov (%p1529_p6, %s33_s10), 0  ;;  %s1305_s19 = scalar_lea.vmem %s232_s13, 64 }
  0x1c   : > { %p1306_p1 = scmp.ne.s32.totalorder %s232_s13, %s1305_s19  ;;  %p1313_p9 = scmp.lt.s32.totalorder %s232_s13, %s232_s13 }
  0x1d   : > { %p1314_p10 = scmp.lt.s32.totalorder %s1305_s19, %s1305_s19 }
  0x1e   : > { %p1308_p4 = pnand %p1306_p1, %p1270_p7 }
  0x1f   : > { %p1315_p11 = por %p1314_p10, %p1313_p9 }
  0x20   : > { %p1309_p8 = pneg %p1308_p4 }
  0x22   : > { %p1316_p12 = pnand %p1315_p11, %p1309_p8 }
  0x24   : > { %1319 = shalt.err (!%p1316_p12)
}
  0x25   : > { %1172 = dma.hbm_to_vmem [thread:$0]  (!%p1524_p5), %s1683_s0, 64, %s232_s13, [#allocation7]  }
  0x26   : > { %s1440_s22 = smov [#allocation11]   ;;  %s1441_s27 = smov [#allocation12]  }
  0x27   : > { %s258_s23 = sshll.u32 %s1440_s22, 4  ;;  %s271_s28 = sshll.u32 %s1441_s27, 4  ;;  %s259_s23 = int_to_ptr.vmem [resolvable:$true] %s258_s23  ;;  %s272_s28 = int_to_ptr.vmem [resolvable:$true] %s271_s28 }
  0x28   : > { %s1331_s11 = scalar_lea.vmem %s259_s23, 48  ;;  %s1338_s12 = scalar_lea.vmem %s259_s23, 64 }
  0x29   : > { %p1332_p6 = scmp.ne.s32.totalorder %s259_s23, %s1331_s11  ;;  %p1339_p1 = scmp.lt.s32.totalorder %s259_s23, %s259_s23 }
  0x2a   : > { %p1340_p4 = scmp.lt.s32.totalorder %s1338_s12, %s1331_s11 }
  0x2b   : > { %p1334_p13 = pnand %p1332_p6, %p1270_p7 }
  0x2c   : > { %p1341_p8 = por %p1340_p4, %p1339_p1 }
  0x2d   : > { %p1335_p0 = pneg %p1334_p13 }
  0x2f   : > { %p1342_p9 = pnand %p1341_p8, %p1335_p0 }
  0x31   : > { %1345 = shalt.err (!%p1342_p9)
}
  0x32   : > { %1178 = dma.hbm_to_vmem [thread:$0]  (!%p1524_p5), %s1686_s3, 48, %s259_s23, [#allocation10]  }
  0x33   : > { %s1357_s15 = scalar_lea.vmem %s272_s28, 3072  ;;  %p1365_p6 = scmp.lt.s32.totalorder %s272_s28, %s272_s28 }
  0x34   : > { %p1358_p10 = scmp.ne.s32.totalorder %s272_s28, %s1357_s15  ;;  %p1366_p13 = scmp.lt.s32.totalorder %s1357_s15, %s1357_s15 }
  0x36   : > { %p1360_p11 = pnand %p1358_p10, %p1270_p7  ;;  %p1367_p2 = por %p1366_p13, %p1365_p6 }
  0x38   : > { %p1361_p12 = pneg %p1360_p11 }
  0x3a   : > { %p1368_p1 = pnand %p1367_p2, %p1361_p12 }
  0x3c   : > { %1371 = shalt.err (!%p1368_p1)
}
  0x3d   : > { %s1442_s16 = smov 64   ;;  %s1443_s17 = smov 4  }
  0x3e   : > { %1181 = dma.hbm_to_vmem [thread:$0]  (!%p1524_p5), %s1688_s5, 3072, %s272_s28, [#allocation13], %s1442_s16, %s1442_s16, %s1443_s17  }
  0x3f   : > { %290 = sbr.rel (%p1516_p3) target bundleno = 615 (0x267), region = 48  ;;  %p1697_p0 = scmp.ne.s32.totalorder (!%p1516_p3), %s1693_s30, 0 }
  0x44   : > { %1409 = dma.done.wait (%p1697_p0), [#allocation7], 64  }
  0x45   : > { %1411 = vsyncadd (%p1697_p0), [#allocation7], 4294967232 }
  0x46   : > { %1413 = dma.done.wait (%p1697_p0), [#allocation10], 816  }
  0x47   : > { %1415 = vsyncadd (%p1697_p0), [#allocation10], 4294966480 }
  0x48   : > { %1417 = dma.done.wait (%p1697_p0), [#allocation13], 3072  }
  0x49   : > { %1419 = vsyncadd (%p1697_p0), [#allocation13], 4294964224  ;;  %v1444_v0 = vmov 0.0   ;;  %vm1445_vm0 = vmmov 0   ;;  %v1446_v1 = vmov 0   ;;  %vm383_vm1 = vcmask 261120  }
  0x4a   : > { %1121 = vmatprep.subr.bf16.mxu1 %v1444_v0  ;;  %1125 = vmatprep.mubr.msk.bf16.mxu1 %vm1445_vm0, %v1444_v0  ;;  %v1232_v2 = vld [vmem:[#allocation9 + $0x1c] ss:$12 sps:$4 sm:$0xff]   ;;  %v1234_v3 = vld [vmem:[#allocation9 + $0x20] ss:$12 sps:$4 sm:$0xff]   ;;  %v1235_v4 = vld [vmem:[#allocation9 + $0x18] ss:$12 sps:$4 sm:$0xff]   ;;  %v336_v9 = vlaneseq }
  0x4b   : > { %419 = vmatprep.mubr.bf16.mxu0 %v1446_v1  ;;  %399 = vmatprep.subr.bf16.mxu0 %v1232_v2  ;;  %v1236_v5 = vld [vmem:[#allocation9 + $0x4] ss:$12 sps:$4 sm:$0xff]   ;;  %v1238_v6 = vld [vmem:[#allocation9 + $0x8] ss:$12 sps:$4 sm:$0xff]   ;;  %v1239_v7 = vld [vmem:[#allocation9] ss:$12 sps:$4 sm:$0xff]  }
  0x4c   : > { %1122 = vmatpush3.bf16.msra.mxu1 %v1234_v3  ;;  %400 = vmatpush1.bf16.msra.mxu0 %v1235_v4  ;;  %v325_v8 = vld [vmem:[#allocation6] sm:$0xf]  ;;  %v337_v10 = vshrl.u32 %v336_v9, 7  ;;  %v334_v12 = vld [vmem:[%s1685_s2] sm:$0x7]  ;;  %p1056_p2 = scmp.ne.s32.totalorder %s1426_s24, 0 }
  0x4d   : > { %1123 = vmatprep.subr.bf16.mxu1 %v1444_v0  ;;  %401 = vmatprep.subr.bf16.mxu0 %v1236_v5 }
  0x4e   : > { %v1585_v11 = vsub.s32 2, %v337_v10  ;;  %v1590_v13 = vsub.s32 0, %v337_v10  ;;  %v1592_v14 = vsub.s32 1, %v337_v10 }
  0x50   : > { %1124 = vmatpush3.bf16.msra.mxu1 %v1238_v6  ;;  %402 = vmatpush1.bf16.msra.mxu0 %v1239_v7  ;;  %v347_v15 = vrot.slane %v334_v12, %v1585_v11  ;;  %v339_v16 = vrot.slane %v334_v12, %v1590_v13  ;;  %v343_v18 = vrot.slane %v334_v12, %v1592_v14 }
  0x53   : > { %1126 = vmatmul.mubr.msk.bf16.vlgmr.msra.gmra.mxu1 %vm383_vm1, %v325_v8  ;;  %1054 = vmatmul.mubr.msk.bf16.vlgmr.msra.gmra.mxu0 %vm383_vm1, %v325_v8 }
 0x113   : > { %v462_v17 = vpop.f32.mrf.mxu1  ;;  %v421_v20 = vpop.f32.mrf.mxu0 }
 0x114   : > { %v463_v19 = vadd.f32 %v462_v17, %v347_v15  ;;  %v422_v21 = vadd.f32 %v421_v20, %v339_v16 }
 0x115   : > { %v1127_v22 = vpop.f32.mrf.mxu1  ;;  %v423_v24 = vpop.f32.mrf.mxu0  ;;  %474 = sbr.rel (%p1056_p2) target bundleno = 344 (0x158), region = 68 }
 0x116   : > { %v1597_v23 = vmax.f32 %v463_v19, 0.0  ;;  %v1599_v25 = vmax.f32 %v422_v21, 0.0  ;;  %v424_v26 = vadd.f32 %v423_v24, %v343_v18 }
 0x117   : > { %v465_v27 = vpop.f32.mrf.mxu1  ;;  %v425_v28 = vpop.f32.mrf.mxu0 }
 0x118   : > { %v1601_v29 = vmax.f32 %v424_v26, 0.0 }
 0x119   : > { %v1128_v30 = vpop.f32.mrf.mxu1  ;;  %v426_v31 = vpop.f32.mrf.mxu0 }
 0x11a   : > { %vm1604_vm2 = vcmp.lt.s32.totalorder %v336_v9, 384  ;;  %v497_v33 = vrot.slane %v1599_v25, 4  ;;  %v503_v34 = vrot.slane %v1601_v29, 4  ;;  %v1447_v35 = vmov 0.0  }
 0x11b   : > { %483 = vst.msk [vmem:[#allocation2] sm:$0x7] %vm1604_vm2, %v1447_v35  ;;  %484 = vst.msk [vmem:[#allocation3] sm:$0x7] %vm1604_vm2, %v1447_v35  ;;  %v509_v36 = vrot.slane %v1597_v23, 4  ;;  %v549_v37 = vmul.f32 %v1599_v25, %v1599_v25  ;;  %v550_v38 = vmul.f32 %v1601_v29, %v1601_v29  ;;  %v551_v43 = vmul.f32 %v1597_v23, %v1597_v23 }
 0x11c   : > { %599 = vst [vmem:[#allocation14] sm:$0xff] %v1447_v35  ;;  %v498_v39 = vadd.f32 %v497_v33, %v1599_v25  ;;  %v504_v40 = vadd.f32 %v503_v34, %v1601_v29  ;;  %v1448_v41 = vmov 1966171168  }
 0x11d   : > { %v520_v42 = vunpack.c.l.s4 %v1448_v41  ;;  %v510_v44 = vadd.f32 %v509_v36, %v1597_v23  ;;  %v552_v45 = vrot.slane %v549_v37, 4  ;;  %v558_v46 = vrot.slane %v550_v38, 4 }
 0x11e   : > { %v499_v47 = vrot.slane %v498_v39, 2  ;;  %v505_v48 = vrot.slane %v504_v40, 2  ;;  %v564_v50 = vrot.slane %v551_v43, 4 }
 0x11f   : > { %v521_v49 = vunpack.c.0.s8 %v520_v42  ;;  %v511_v51 = vrot.slane %v510_v44, 2  ;;  %v553_v52 = vadd.f32 %v552_v45, %v549_v37  ;;  %v559_v53 = vadd.f32 %v558_v46, %v550_v38  ;;  %v610_v42 = vld [vmem:[#allocation11] sm:$0x7] }
 0x120   : > { %v500_v54 = vadd.f32 %v499_v47, %v498_v39  ;;  %v506_v55 = vadd.f32 %v505_v48, %v504_v40  ;;  %v565_v56 = vadd.f32 %v564_v50, %v551_v43  ;;  %v615_v45 = vld [vmem:[%s1687_s4] sm:$0x7] }
 0x121   : > { %v512_v57 = vadd.f32 %v511_v51, %v510_v44  ;;  %v554_v58 = vrot.slane %v553_v52, 2  ;;  %v560_v59 = vrot.slane %v559_v53, 2  ;;  %v524_v62 = vsub.s32 %v521_v49, %v337_v10 }
 0x122   : > { %v501_v60 = vrot.slane %v500_v54, 1  ;;  %v507_v61 = vrot.slane %v506_v55, 1  ;;  %v566_v2 = vrot.slane %v565_v56, 2  ;;  %v496_v10 = vld [vmem:[#allocation2] sm:$0x7] }
 0x123   : > { %v513_v63 = vrot.slane %v512_v57, 1  ;;  %v555_v0 = vadd.f32 %v554_v58, %v553_v52  ;;  %v561_v1 = vadd.f32 %v560_v59, %v559_v53  ;;  %v548_v30 = vld [vmem:[#allocation3] sm:$0x7] }
 0x124   : > { %v502_v3 = vadd.f32 %v501_v60, %v500_v54  ;;  %v508_v4 = vadd.f32 %v507_v61, %v506_v55  ;;  %v567_v8 = vadd.f32 %v566_v2, %v565_v56 }
 0x125   : > { %v514_v5 = vadd.f32 %v513_v63, %v512_v57  ;;  %v556_v6 = vrot.slane %v555_v0, 1  ;;  %v562_v7 = vrot.slane %v561_v1, 1 }
 0x126   : > { %v518_v9 = vcombine.low %v502_v3, %v508_v4  ;;  %v568_v17 = vrot.slane %v567_v8, 1 }
 0x127   : > { %v532_v12 = vrot.slane %v514_v5, %v524_v62  ;;  %v557_v15 = vadd.f32 %v556_v6, %v555_v0  ;;  %v563_v16 = vadd.f32 %v562_v7, %v561_v1 }
 0x128   : > { %v525_v18 = vrot.slane %v518_v9, %v524_v62  ;;  %v569_v19 = vadd.f32 %v568_v17, %v567_v8 }
 0x129   : > { %v573_v20 = vcombine.low %v557_v15, %v563_v16 }
 0x12a   : > { %v533_v21 = vcombine.low %v525_v18, %v532_v12  ;;  %v587_v24 = vrot.slane %v569_v19, %v524_v62 }
 0x12b   : > { %v580_v22 = vrot.slane %v573_v20, %v524_v62 }
 0x12c   : > { %v540_v26 = vrot.slane %v533_v21, %v524_v62 }
 0x12d   : > { %v588_v27 = vcombine.low %v580_v22, %v587_v24 }
 0x12e   : > { %v542_v28 = vadd.f32 %v540_v26, %v496_v10 }
 0x12f   : > { %v595_v31 = vrot.slane %v588_v27, %v524_v62 }
 0x130   : > { %547 = vst.msk [vmem:[#allocation2] sm:$0x7] %vm1604_vm2, %v542_v28 }
 0x131   : > { %v597_v33 = vadd.f32 %v595_v31, %v548_v30 }
 0x133   : > { %598 = vst.msk [vmem:[#allocation3] sm:$0x7] %vm1604_vm2, %v597_v33 }
 0x137   : > { %v603_v34 = vld [vmem:[#allocation2] sm:$0x7] }
 0x138   : > { %v604_v35 = vmul.f32 0.125, %v603_v34 }
 0x13a   : > { %v605_v36 = vld [vmem:[#allocation3] sm:$0x7]  ;;  %v607_v37 = vmul.f32 %v604_v35, %v604_v35 }
 0x13b   : > { %v606_v38 = vmul.f32 0.125, %v605_v36 }
 0x13d   : > { %v608_v39 = vsub.f32 %v606_v38, %v607_v37 }
 0x13f   : > { %v609_v40 = vmax.f32 %v608_v39, 0.0 }
 0x141   : > { %v611_v41 = vadd.f32 1e-05, %v609_v40 }
 0x143   : > { %1240 = vrsqrt.f32 %v611_v41 }
 0x150   : > { %v1241_v43 = vpop.eup %1240 }
 0x151   : > { %v613_v44 = vmul.f32 %v1241_v43, %v610_v42 }
 0x153   : > { %614 = vst.msk [vmem:[#allocation4] sm:$0x7] %vm1604_vm2, %v613_v44  ;;  %v616_v46 = vmul.f32 %v613_v44, %v604_v35 }
 0x155   : > { %v617_v47 = vsub.f32 %v615_v45, %v616_v46 }
 0x157   : > { %618 = vst.msk [vmem:[#allocation5] sm:$0x7] %vm1604_vm2, %v617_v47 }
 0x158 PF: > { %p1057_p3 = scmp.ne.s32.totalorder %s1426_s24, 1 }
 0x15a   : > { %622 = sbr.rel (%p1057_p3) target bundleno = 600 (0x258), region = 80 }
 0x15f   : > { %v1242_v48 = vld [vmem:[#allocation12 + $0x78] sm:$0xff]   ;;  %v1449_v49 = vmov 0.0   ;;  %vm1450_vm3 = vmmov 0   ;;  %v1245_v52 = vld [vmem:[#allocation12 + $0x70] sm:$0xff]   ;;  %v1248_v54 = vld [vmem:[#allocation12 + $0x68] sm:$0xff]  }
 0x160   : > { %1129 = vmatprep.subr.bf16.mxu1 %v1449_v49  ;;  %v1243_v50 = vld [vmem:[#allocation12 + $0x38] sm:$0xff]   ;;  %1090 = vmatprep.subr.bf16.mxu0 %v1242_v48  ;;  %v1246_v53 = vld [vmem:[#allocation12 + $0x30] sm:$0xff]   ;;  %v1249_v55 = vld [vmem:[#allocation12 + $0x28] sm:$0xff]  }
 0x161   : > { %v1244_v51 = vld [vmem:[#allocation12 + $0xb8] sm:$0xff]   ;;  %1145 = vmatprep.mubr.msk.bf16.mxu1 %vm1450_vm3, %v1449_v49  ;;  %1091 = vmatpush3.bf16.msra.mxu0 %v1243_v50  ;;  %v1247_v32 = vld [vmem:[#allocation12 + $0xb0] sm:$0xff]   ;;  %v1250_v56 = vld [vmem:[#allocation12 + $0xa8] sm:$0xff]  }
 0x162   : > { %1130 = vmatpush3.bf16.msra.mxu1 %v1244_v51  ;;  %1092 = vmatprep.subr.bf16.mxu0 %v1245_v52  ;;  %v1251_v57 = vld [vmem:[#allocation12 + $0x60] sm:$0xff]   ;;  %v1254_v60 = vld [vmem:[#allocation12 + $0x58] sm:$0xff]   ;;  %v1257_v63 = vld [vmem:[#allocation12 + $0x50] sm:$0xff]  }
 0x163   : > { %1131 = vmatprep.subr.bf16.mxu1 %v1449_v49  ;;  %v1252_v58 = vld [vmem:[#allocation12 + $0x20] sm:$0xff]   ;;  %v1255_v61 = vld [vmem:[#allocation12 + $0x18] sm:$0xff]   ;;  %v1258_v0 = vld [vmem:[#allocation12 + $0x10] sm:$0xff]  }
 0x164   : > { %v1253_v59 = vld [vmem:[#allocation12 + $0xa0] sm:$0xff]   ;;  %v1256_v62 = vld [vmem:[#allocation12 + $0x98] sm:$0xff]   ;;  %v1259_v1 = vld [vmem:[#allocation12 + $0x90] sm:$0xff]  }
 0x165   : > { %1093 = vmatpush3.bf16.msra.mxu0 %v1246_v53  ;;  %v1260_v2 = vld [vmem:[#allocation12 + $0x48] sm:$0xff]   ;;  %v1263_v5 = vld [vmem:[#allocation12 + $0x40] sm:$0xff]   ;;  %v1058_v27 = vld [vmem:[%s1689_s6] ss:$0 sm:$0xff] }
 0x166   : > { %1132 = vmatpush3.bf16.msra.mxu1 %v1247_v32  ;;  %1094 = vmatprep.subr.bf16.mxu0 %v1248_v54  ;;  %v1261_v3 = vld [vmem:[#allocation12 + $0x8] sm:$0xff]   ;;  %v623_v6 = vld [vmem:[#allocation4] sm:$0x7]  ;;  %v643_v7 = vld [vmem:[#allocation5] sm:$0x7] }
 0x167   : > { %1133 = vmatprep.subr.bf16.mxu1 %v1449_v49  ;;  %v1262_v4 = vld [vmem:[#allocation12 + $0x88] sm:$0xff]   ;;  %v632_v8 = vrot.slane %v623_v6, %v1592_v14  ;;  %v652_v9 = vrot.slane %v643_v7, %v1592_v14  ;;  %v628_v12 = vrot.slane %v623_v6, %v1590_v13  ;;  %v648_v15 = vrot.slane %v643_v7, %v1590_v13  ;;  %v1264_v18 = vld [vmem:[#allocation12] sm:$0xff]  }
 0x168   : > { %v636_v16 = vrot.slane %v623_v6, %v1585_v11  ;;  %v656_v17 = vrot.slane %v643_v7, %v1585_v11  ;;  %v1265_v21 = vld [vmem:[#allocation12 + $0x80] sm:$0xff]  }
 0x169   : > { %1095 = vmatpush3.bf16.msra.mxu0 %v1249_v55  ;;  %v641_v19 = vmul.f32 %v632_v8, %v1601_v29  ;;  %v640_v20 = vmul.f32 %v628_v12, %v1599_v25 }
 0x16a   : > { %1134 = vmatpush3.bf16.msra.mxu1 %v1250_v56  ;;  %1096 = vmatprep.subr.bf16.mxu0 %v1251_v57  ;;  %v642_v10 = vmul.f32 %v636_v16, %v1597_v23 }
 0x16b   : > { %1135 = vmatprep.subr.bf16.mxu1 %v1449_v49  ;;  %v661_v14 = vadd.f32 %v652_v9, %v641_v19  ;;  %v660_v22 = vadd.f32 %v648_v15, %v640_v20 }
 0x16c   : > { %v662_v13 = vadd.f32 %v656_v17, %v642_v10 }
 0x16d   : > { %1097 = vmatpush3.bf16.msra.mxu0 %v1252_v58  ;;  %v664_v24 = vpack.c.bf16 %v661_v14, %v661_v14  ;;  %v663_v26 = vpack.c.bf16 %v660_v22, %v660_v22 }
 0x16e   : > { %1136 = vmatpush3.bf16.msra.mxu1 %v1253_v59  ;;  %1098 = vmatprep.subr.bf16.mxu0 %v1254_v60  ;;  %v665_v11 = vpack.c.bf16 %v662_v13, %v662_v13 }
 0x16f   : > { %1137 = vmatprep.subr.bf16.mxu1 %v1449_v49  ;;  %897 = vmatprep.mubr.bf16.mxu0 %v664_v24 }
 0x171   : > { %1099 = vmatpush3.bf16.msra.mxu0 %v1255_v61 }
 0x172   : > { %1138 = vmatpush3.bf16.msra.mxu1 %v1256_v62  ;;  %1100 = vmatprep.subr.bf16.mxu0 %v1257_v63 }
 0x173   : > { %1139 = vmatprep.subr.bf16.mxu1 %v1449_v49 }
 0x175   : > { %1101 = vmatpush3.bf16.msra.mxu0 %v1258_v0 }
 0x176   : > { %1140 = vmatpush3.bf16.msra.mxu1 %v1259_v1  ;;  %1102 = vmatprep.subr.bf16.mxu0 %v1260_v2 }
 0x177   : > { %1141 = vmatprep.subr.bf16.mxu1 %v1449_v49 }
 0x179   : > { %1103 = vmatpush3.bf16.msra.mxu0 %v1261_v3 }
 0x17a   : > { %1142 = vmatpush3.bf16.msra.mxu1 %v1262_v4  ;;  %1104 = vmatprep.subr.bf16.mxu0 %v1263_v5 }
 0x17b   : > { %1143 = vmatprep.subr.bf16.mxu1 %v1449_v49 }
 0x17d   : > { %1105 = vmatpush3.bf16.msra.mxu0 %v1264_v18 }
 0x17e   : > { %1144 = vmatpush3.bf16.msra.mxu1 %v1265_v21 }
 0x180   : > { %898 = vmatmul.mubr.bf16.vlgmr.msra.gmra.mxu0 %v663_v26 }
 0x181   : > { %1146 = vmatmul.mubr.bf16.vlgmr.msra.gmra.mxu1 %v665_v11 }
 0x240   : > { %v1106_v29 = vpop.f32.mrf.mxu0 }
 0x241   : > { %v939_v25 = vpop.f32.mrf.mxu1 }
 0x242   : > { %v1107_v23 = vpop.f32.mrf.mxu0 }
 0x243   : > { %v1108_v28 = vadd.f32 %v1107_v23, %v1106_v29  ;;  %v1147_v30 = vpop.f32.mrf.mxu1 }
 0x244   : > { %v1109_v31 = vpop.f32.mrf.mxu0 }
 0x245   : > { %v900_v33 = vadd.f32 %v1108_v28, %v1058_v27  ;;  %v942_v34 = vpop.f32.mrf.mxu1 }
 0x246   : > { %v1110_v35 = vpop.f32.mrf.mxu0 }
 0x247   : > { %v940_v36 = vadd.f32 %v939_v25, %v900_v33  ;;  %v1148_v37 = vpop.f32.mrf.mxu1 }
 0x249   : > { %1266 = vtanh.f32 %v940_v36 }
 0x256   : > { %v1267_v38 = vpop.eup %1266 }
 0x257   : > { %946 = vst [vmem:[#allocation14] sm:$0xff] %v1267_v38 }
 0x258 PF: > { %p1659_p5 = scmp.eq.s32.totalorder %s1037_s29, 1  ;;  %s1451_s23 = smov [#allocation14]  }
 0x259   : > { %s956_s27 = sshll.u32 %s1451_s23, 4  ;;  %s957_s27 = int_to_ptr.vmem [resolvable:$true] %s956_s27 }
 0x25a   : > { %s1372_s28 = scalar_lea.vmem %s957_s27, 128  ;;  %p1379_p9 = scmp.lt.s32.totalorder %s957_s27, %s957_s27 }
 0x25b   : > { %p1373_p7 = scmp.ne.s32.totalorder %s957_s27, %s1372_s28  ;;  %p1380_p10 = scmp.lt.s32.totalorder %s1372_s28, %s1372_s28 }
 0x25d   : > { %p1374_p4 = pnand %p1373_p7, %p1659_p5  ;;  %p1381_p11 = por %p1380_p10, %p1379_p9 }
 0x25f   : > { %p1375_p8 = pneg %p1374_p4 }
 0x261   : > { %p1382_p12 = pnand %p1381_p11, %p1375_p8 }
 0x263   : > { %1385 = shalt.err (!%p1382_p12)
}
 0x264   : > { %1166 = dma.vmem_to_hbm [thread:$0]  (%p1659_p5), %s957_s27, 128, %s1690_s7, [#allocation8]  }
 0x265   : > { %1421 = dma.done.wait (%p1659_p5), [#allocation8], 128  }
 0x266   : > { %1423 = vsyncadd (%p1659_p5), [#allocation8], 4294967168 }
 0x267 PF: > { %s21_s26 = sadd.s32 1, %s1434_s26   ;;  %s1701_s24 = smov %s1430_s25 }
 0x268   : > { %p18_p6 = scmp.ge.s32.totalorder %s21_s26, 4   ;;  %s1702_s25 = smov %s1704_s10 }
 0x26a   :  { %20 = sbr.rel (!%p18_p6) target bundleno = 5 (0x5), region = 107 }
 0x26f   :  { %969 = vsyncpa [#allocation7], 1 }
 0x270   :  { %971 = vsyncpa [#allocation7 + $0x1], 1 }
 0x271   :  { %972 = vsyncpa [#allocation10], 1 }
 0x272   :  { %973 = vsyncpa [#allocation13], 1 }
 0x273   :  { %974 = vsyncpa [#allocation8], 1 }
 0x274   :  { %976 = vsyncpa [#allocation8 + $0x1], 1 }

</bundles_post_ra>
